<compile_context>
chip_gen: v7x
topology: tpu7x:2x2x1
jax: 0.10.0
libtpu: 0.0.40
codegen_flags: <defaults>
</compile_context>

<pallas_src>
import functools
import math

import jax
import jax.numpy as jnp
from jax.experimental import pallas as pl
from jax.experimental.pallas import tpu as pltpu

LN_EPS = 1e-12                    # BertConfig layer_norm_eps
COMPUTE_DTYPE = jnp.bfloat16      # activation / weight dtype fed to the MXU


# ----------------------------------------------------------------------------
# Tile-size helper: largest tile <= target that divides dim and is a multiple
# of `align` (so every BlockSpec dim is either a multiple of (8,128) or the
# full array dim).
# ----------------------------------------------------------------------------
def _pick_tile(dim, target, align):
    if dim <= target:
        return dim
    t = (target // align) * align
    while t >= align:
        if dim % t == 0:
            return t
        t -= align
    return dim


# ----------------------------------------------------------------------------
# Pallas kernels
# ----------------------------------------------------------------------------
def _matmul_kernel(x_ref, w_ref, b_ref, o_ref, acc_ref, *, act):
    """Tiled y = act(x @ w + b). K is the last grid axis (accumulated)."""
    k = pl.program_id(2)

    @pl.when(k == 0)
    def _init():
        acc_ref[...] = jnp.zeros_like(acc_ref)

    w = w_ref[0] if len(w_ref.shape) == 3 else w_ref[...]
    acc_ref[...] += jnp.dot(x_ref[...], w, preferred_element_type=jnp.float32)

    @pl.when(k == pl.num_programs(2) - 1)
    def _finalize():
        y = acc_ref[...] + b_ref[...].reshape(1, -1).astype(jnp.float32)
        if act == "gelu":      # exact (erf-based) gelu, as in HF "gelu"
            y = 0.5 * y * (1.0 + jax.lax.erf(y * (1.0 / math.sqrt(2.0))))
        elif act == "relu":
            y = jnp.maximum(y, 0.0)
        o_ref[...] = y.reshape(o_ref.shape).astype(o_ref.dtype)


def _matmul_res_ln_kernel(x_ref, w_ref, b_ref, res_ref, g_ref, beta_ref,
                          o_ref, acc_ref, *, eps):
    """Tiled y = LayerNorm(x @ w + b + res) * g + beta (full H on lanes)."""
    k = pl.program_id(1)

    @pl.when(k == 0)
    def _init():
        acc_ref[...] = jnp.zeros_like(acc_ref)

    acc_ref[...] += jnp.dot(x_ref[...], w_ref[...],
                            preferred_element_type=jnp.float32)

    @pl.when(k == pl.num_programs(1) - 1)
    def _finalize():
        h = (acc_ref[...] + b_ref[...].astype(jnp.float32)
             + res_ref[...].astype(jnp.float32))
        mu = jnp.mean(h, axis=-1, keepdims=True)
        var = jnp.mean((h - mu) * (h - mu), axis=-1, keepdims=True)
        y = (h - mu) * jax.lax.rsqrt(var + eps)
        o_ref[...] = (y * g_ref[...].astype(jnp.float32)
                      + beta_ref[...].astype(jnp.float32)).astype(o_ref.dtype)


def _ln_kernel(x_ref, g_ref, b_ref, o_ref, *, eps):
    """Plain LayerNorm over the feature (last) axis — used for embeddings."""
    h = x_ref[...].astype(jnp.float32)
    mu = jnp.mean(h, axis=-1, keepdims=True)
    var = jnp.mean((h - mu) * (h - mu), axis=-1, keepdims=True)
    y = (h - mu) * jax.lax.rsqrt(var + eps)
    o_ref[...] = (y * g_ref[...].astype(jnp.float32)
                  + b_ref[...].astype(jnp.float32)).astype(o_ref.dtype)


def _attn_kernel(qkv_ref, bias_ref, o_ref, *, scale, n_heads, head_dim):
    """Per batch element: all heads of softmax(q k^T * scale + bias) v.

    The fused QKV projection output arrives as one (3, S, H) block; the
    additive padding mask is (1, 1, S) and broadcast over heads / query rows
    here.  Heads are statically unrolled (<= 16 for BERT-class models) and
    the per-batch context is written back as one lane-dense (S, H) store.
    """
    q = qkv_ref[0]                    # (S, H) bf16
    k = qkv_ref[1]                    # (S, H) bf16
    v = qkv_ref[2]                    # (S, H) bf16
    bias = bias_ref[0]                # (1, S) f32, broadcasts over query rows

    outs = []
    # TODO(synk): for head_dim < 128 process >=2 heads per matmul to keep the
    #             MXU/store lanes dense; one head per iteration is correct but
    #             uses only head_dim lanes of the P@V matmul.
    for h in range(n_heads):
        sl = slice(h * head_dim, (h + 1) * head_dim)
        qh, kh, vh = q[:, sl], k[:, sl], v[:, sl]
        # q @ k^T without an explicit transpose (contract last dims of both).
        s = jax.lax.dot_general(qh, kh, (((1,), (1,)), ((), ())),
                                preferred_element_type=jnp.float32)
        s = s * scale + bias
        s = s - jnp.max(s, axis=-1, keepdims=True)
        p = jnp.exp(s)
        p = p * pl.reciprocal(jnp.sum(p, axis=-1, keepdims=True), approx=True)
        outs.append(jnp.dot(p.astype(vh.dtype), vh,
                            preferred_element_type=jnp.float32))
    # Single lane-dense (S, H) store.
    o_ref[...] = jnp.concatenate(outs, axis=-1).astype(o_ref.dtype)


# ----------------------------------------------------------------------------
# pallas_call wrappers
# ----------------------------------------------------------------------------
def linear(x, w, b, act=None, *, tm=256, tn=512, tk=1024):
    """y = act(x @ w + b); x:(M,K) bf16, w:(K,N) bf16, b:(N,) f32 → (M,N)."""
    M, K = x.shape
    N = w.shape[1]
    tm = _pick_tile(M, tm, 8)
    tn = _pick_tile(N, tn, 128)
    tk = _pick_tile(K, tk, 128)
    grid = (M // tm, N // tn, K // tk)
    return pl.pallas_call(
        functools.partial(_matmul_kernel, act=act),
        out_shape=jax.ShapeDtypeStruct((M, N), x.dtype),
        grid=grid,
        in_specs=[
            pl.BlockSpec((tm, tk), lambda i, j, k: (i, k)),
            pl.BlockSpec((tk, tn), lambda i, j, k: (k, j)),
            pl.BlockSpec((1, tn), lambda i, j, k: (0, j)),
        ],
        out_specs=pl.BlockSpec((tm, tn), lambda i, j, k: (i, j)),
        scratch_shapes=[pltpu.VMEM((tm, tn), jnp.float32)],
        compiler_params=pltpu.CompilerParams(
            dimension_semantics=("parallel", "parallel", "arbitrary")),
    )(x, w, b.reshape(1, N))


def qkv_projection(x, w_qkv, b_qkv, *, tm=256, tn=512, tk=1024):
    """Fused Q/K/V projection.

    x:(M,K) bf16, w_qkv:(3,K,H) bf16, b_qkv:(3,1,H) f32 → (3, M, H) bf16 so
    the attention kernel can read one (3, S, H) block per batch element.
    """
    M, K = x.shape
    n_comp, _, H = w_qkv.shape
    tm = _pick_tile(M, tm, 8)
    tn = _pick_tile(H, tn, 128)      # tile within one of the 3 components
    tk = _pick_tile(K, tk, 128)
    cpc = H // tn                    # column blocks per component
    grid = (M // tm, n_comp * cpc, K // tk)
    return pl.pallas_call(
        functools.partial(_matmul_kernel, act=None),
        out_shape=jax.ShapeDtypeStruct((n_comp, M, H), x.dtype),
        grid=grid,
        in_specs=[
            pl.BlockSpec((tm, tk), lambda i, j, k: (i, k)),
            pl.BlockSpec((1, tk, tn), lambda i, j, k: (j // cpc, k, j % cpc)),
            pl.BlockSpec((1, 1, tn), lambda i, j, k: (j // cpc, 0, j % cpc)),
        ],
        out_specs=pl.BlockSpec((1, tm, tn),
                               lambda i, j, k: (j // cpc, i, j % cpc)),
        scratch_shapes=[pltpu.VMEM((tm, tn), jnp.float32)],
        compiler_params=pltpu.CompilerParams(
            dimension_semantics=("parallel", "parallel", "arbitrary")),
    )(x, w_qkv, b_qkv)


def attention(qkv, bias, scale, n_heads, bs, seqlen):
    """qkv:(3, bs*S, H) bf16, bias:(bs,1,S) f32 → context (bs*S, H) bf16."""
    _, M, H = qkv.shape
    dh = H // n_heads
    return pl.pallas_call(
        functools.partial(_attn_kernel, scale=scale, n_heads=n_heads,
                          head_dim=dh),
        out_shape=jax.ShapeDtypeStruct((M, H), qkv.dtype),
        grid=(bs,),
        in_specs=[
            pl.BlockSpec((3, seqlen, H), lambda b: (0, b, 0)),   # Q, K, V slab
            pl.BlockSpec((1, 1, seqlen), lambda b: (b, 0, 0)),   # additive mask
        ],
        out_specs=pl.BlockSpec((seqlen, H), lambda b: (b, 0)),
        compiler_params=pltpu.CompilerParams(
            dimension_semantics=("parallel",)),
    )(qkv, bias)


def linear_residual_layernorm(x, w, b, res, gamma, beta, *, tm=256, tk=1024):
    """LayerNorm(x @ w + b + res) with the LN fused into the matmul epilogue."""
    M, K = x.shape
    H = w.shape[1]
    tm = _pick_tile(M, tm, 8)
    tk = _pick_tile(K, tk, 128)
    grid = (M // tm, K // tk)
    return pl.pallas_call(
        functools.partial(_matmul_res_ln_kernel, eps=LN_EPS),
        out_shape=jax.ShapeDtypeStruct((M, H), res.dtype),
        grid=grid,
        in_specs=[
            pl.BlockSpec((tm, tk), lambda i, k: (i, k)),
            pl.BlockSpec((tk, H), lambda i, k: (k, 0)),
            pl.BlockSpec((1, H), lambda i, k: (0, 0)),
            pl.BlockSpec((tm, H), lambda i, k: (i, 0)),
            pl.BlockSpec((1, H), lambda i, k: (0, 0)),
            pl.BlockSpec((1, H), lambda i, k: (0, 0)),
        ],
        out_specs=pl.BlockSpec((tm, H), lambda i, k: (i, 0)),
        scratch_shapes=[pltpu.VMEM((tm, H), jnp.float32)],
        compiler_params=pltpu.CompilerParams(
            dimension_semantics=("parallel", "arbitrary")),
    )(x, w, b.reshape(1, H), res, gamma.reshape(1, H), beta.reshape(1, H))


def layernorm(x, gamma, beta, out_dtype, *, tm=256):
    """Dedicated LN (no zero residual tensor) for the embedding output."""
    M, H = x.shape
    tm = _pick_tile(M, tm, 8)
    return pl.pallas_call(
        functools.partial(_ln_kernel, eps=LN_EPS),
        out_shape=jax.ShapeDtypeStruct((M, H), out_dtype),
        grid=(M // tm,),
        in_specs=[
            pl.BlockSpec((tm, H), lambda i: (i, 0)),
            pl.BlockSpec((1, H), lambda i: (0, 0)),
            pl.BlockSpec((1, H), lambda i: (0, 0)),
        ],
        out_specs=pl.BlockSpec((tm, H), lambda i: (i, 0)),
        compiler_params=pltpu.CompilerParams(
            dimension_semantics=("parallel",)),
    )(x, gamma.reshape(1, H), beta.reshape(1, H))


# ----------------------------------------------------------------------------
# Deterministic parameter init (BertConfig initializer_range = 0.02)
# ----------------------------------------------------------------------------
def init_params(key, vocab, hidden, n_heads, ffn, n_layers, n_positions,
                gelu_activation=True):
    std = 0.02

    def nrm(k, shape):
        return (std * jax.random.normal(k, shape)).astype(jnp.float32)

    keys = jax.random.split(key, 3 + 8 * n_layers)
    params = {
        "word_emb": nrm(keys[0], (vocab, hidden)),
        "pos_emb": nrm(keys[1], (n_positions, hidden)),
        "type_emb": nrm(keys[2], (2, hidden)),
        "emb_ln_g": jnp.ones((hidden,), jnp.float32),
        "emb_ln_b": jnp.zeros((hidden,), jnp.float32),
        "n_heads": n_heads,
        "gelu_activation": gelu_activation,
        "layers": [],
    }
    for l in range(n_layers):
        k = keys[3 + 8 * l: 3 + 8 * (l + 1)]
        wq = nrm(k[0], (hidden, hidden))
        wk = nrm(k[1], (hidden, hidden))
        wv = nrm(k[2], (hidden, hidden))
        params["layers"].append({
            "w_qkv": jnp.stack([wq, wk, wv], axis=0).astype(COMPUTE_DTYPE),
            "b_qkv": jnp.zeros((3, 1, hidden), jnp.float32),
            "wo": nrm(k[3], (hidden, hidden)).astype(COMPUTE_DTYPE),
            "bo": jnp.zeros((hidden,), jnp.float32),
            "ln1_g": jnp.ones((hidden,), jnp.float32),
            "ln1_b": jnp.zeros((hidden,), jnp.float32),
            "wi": nrm(k[4], (hidden, ffn)).astype(COMPUTE_DTYPE),
            "bi": jnp.zeros((ffn,), jnp.float32),
            "wo2": nrm(k[5], (ffn, hidden)).astype(COMPUTE_DTYPE),
            "bo2": jnp.zeros((hidden,), jnp.float32),
            "ln2_g": jnp.ones((hidden,), jnp.float32),
            "ln2_b": jnp.zeros((hidden,), jnp.float32),
        })
    return params


# ----------------------------------------------------------------------------
# Forward pass (mirrors HFTransformer.forward with causal=False, encoder mode)
# ----------------------------------------------------------------------------
def hf_transformer_forward(params, x, lengths, attention_mask, token_type_ids,
                           positions=None, output_hidden_states=False):
    """x: (slen, bs) int32 word ids; attention_mask / token_type_ids: (bs, slen)."""
    del lengths  # only used by the causal path (not exercised here)
    slen, bs = x.shape
    H = params["word_emb"].shape[1]
    nH = params["n_heads"]
    dh = H // nH
    M = bs * slen

    input_ids = x.T  # (bs, slen) — mirrors x.transpose(0, 1)
    if positions is None:
        positions = jnp.broadcast_to(
            jnp.arange(slen, dtype=jnp.int32)[None, :], (bs, slen))
    else:
        positions = positions.T

    # Embedding gathers are plain JAX glue (XLA fuses gather+add); LayerNorm
    # is a Pallas kernel.
    emb = (jnp.take(params["word_emb"], input_ids, axis=0)
           + jnp.take(params["pos_emb"], positions, axis=0)
           + jnp.take(params["type_emb"], token_type_ids, axis=0))  # (bs,slen,H) f32
    hs = layernorm(emb.reshape(M, H), params["emb_ln_g"], params["emb_ln_b"],
                   out_dtype=COMPUTE_DTYPE)

    # HF extended attention mask as a compact (bs, 1, S) additive bias;
    # broadcast over heads/queries happens inside the attention kernel.
    neg = jnp.finfo(jnp.float32).min
    bias = ((1.0 - attention_mask.astype(jnp.float32)) * neg).reshape(bs, 1, slen)

    scale = 1.0 / math.sqrt(dh)
    act = "gelu" if params["gelu_activation"] else "relu"

    all_hidden = ([hs.reshape(bs, slen, H).astype(jnp.float32)]
                  if output_hidden_states else None)

    for lp in params["layers"]:
        qkv = qkv_projection(hs, lp["w_qkv"], lp["b_qkv"])          # (3, M, H)
        ctx = attention(qkv, bias, scale, nH, bs, slen)             # (M, H)
        # BertSelfOutput: dense + residual + LN, fused.
        hs = linear_residual_layernorm(ctx, lp["wo"], lp["bo"], hs,
                                       lp["ln1_g"], lp["ln1_b"])
        inter = linear(hs, lp["wi"], lp["bi"], act=act)             # BertIntermediate
        # BertOutput: dense + residual + LN, fused.
        hs = linear_residual_layernorm(inter, lp["wo2"], lp["bo2"], hs,
                                       lp["ln2_g"], lp["ln2_b"])
        if output_hidden_states:
            all_hidden.append(hs.reshape(bs, slen, H).astype(jnp.float32))

    seq_out = hs.reshape(bs, slen, H).astype(jnp.float32)
    tensor = jnp.transpose(seq_out, (1, 0, 2))   # (slen, bs, H)
    return tensor, (tuple(all_hidden) if output_hidden_states else None)


# ----------------------------------------------------------------------------
if __name__ == "__main__":
    VOCAB, H, NH, FFN, LAYERS, NPOS = 50, 32, 4, 64, 2, 16
    BS, SLEN = 2, 8

    root = jax.random.PRNGKey(0)
    pkey, xkey = jax.random.split(root)
    params = init_params(pkey, VOCAB, H, NH, FFN, LAYERS, NPOS,
                         gelu_activation=True)

    x = jax.random.randint(xkey, (SLEN, BS), 0, VOCAB, dtype=jnp.int32)  # (slen, bs)
    lengths = jnp.array([SLEN, SLEN - 2], dtype=jnp.int32)
    attention_mask = (jnp.arange(SLEN)[None, :]
                      < lengths[:, None]).astype(jnp.int32)              # (bs, slen)
    token_type_ids = jnp.zeros((BS, SLEN), dtype=jnp.int32)

    tensor, hidden = hf_transformer_forward(
        params, x, lengths, attention_mask, token_type_ids)
    tensor = jax.block_until_ready(tensor)

    assert tensor.shape == (SLEN, BS, H)
    assert bool(jnp.all(jnp.isfinite(tensor)))
    print("KERNEL_OK")
</pallas_src>

<mosaic_0001>
module attributes {stable_mosaic.version = 11 : i64} {
  func.func @_ln_kernel(%arg0: i32, %arg1: memref<16x32xf32, #tpu.memory_space<vmem>>, %arg2: memref<1x32xf32, #tpu.memory_space<vmem>>, %arg3: memref<1x32xf32, #tpu.memory_space<vmem>>, %arg4: memref<16x32xbf16, #tpu.memory_space<vmem>>) attributes {dimension_semantics = [#tpu.dimension_semantics<parallel>], iteration_bounds = array<i64: 1>, scalar_prefetch = 0 : i64, scratch_operands = 0 : i64, tpu.core_type = #tpu.core_type<tc>, window_params = [{transform_indices = @transform_0, window_bounds = array<i64: 16, 32>}, {pipeline_mode = #tpu.pipeline_mode<synchronous>, transform_indices = @transform_1, window_bounds = array<i64: 1, 32>}, {pipeline_mode = #tpu.pipeline_mode<synchronous>, transform_indices = @transform_2, window_bounds = array<i64: 1, 32>}, {transform_indices = @transform_3, window_bounds = array<i64: 16, 32>}]} {
    %c0 = arith.constant 0 : index
    %c0_0 = arith.constant 0 : index
    %0 = vector.load %arg1[%c0, %c0_0] : memref<16x32xf32, #tpu.memory_space<vmem>>, vector<16x32xf32>
    %cst = arith.constant dense<0.000000e+00> : vector<16xf32>
    %1 = vector.multi_reduction <add>, %0, %cst [1] : vector<16x32xf32> to vector<16xf32>
    %2 = vector.shape_cast %1 : vector<16xf32> to vector<16x1xf32>
    %cst_1 = arith.constant 3.200000e+01 : f32
    %3 = vector.broadcast %cst_1 : f32 to vector<16x1xf32>
    %4 = arith.divf %2, %3 : vector<16x1xf32>
    %5 = vector.broadcast %4 : vector<16x1xf32> to vector<16x32xf32>
    %6 = arith.subf %0, %5 : vector<16x32xf32>
    %7 = vector.broadcast %4 : vector<16x1xf32> to vector<16x32xf32>
    %8 = arith.subf %0, %7 : vector<16x32xf32>
    %9 = arith.mulf %6, %8 : vector<16x32xf32>
    %cst_2 = arith.constant dense<0.000000e+00> : vector<16xf32>
    %10 = vector.multi_reduction <add>, %9, %cst_2 [1] : vector<16x32xf32> to vector<16xf32>
    %11 = vector.shape_cast %10 : vector<16xf32> to vector<16x1xf32>
    %cst_3 = arith.constant 3.200000e+01 : f32
    %12 = vector.broadcast %cst_3 : f32 to vector<16x1xf32>
    %13 = arith.divf %11, %12 : vector<16x1xf32>
    %14 = vector.broadcast %4 : vector<16x1xf32> to vector<16x32xf32>
    %15 = arith.subf %0, %14 : vector<16x32xf32>
    %cst_4 = arith.constant 9.99999996E-13 : f32
    %16 = vector.broadcast %cst_4 : f32 to vector<16x1xf32>
    %17 = arith.addf %13, %16 : vector<16x1xf32>
    %18 = math.rsqrt %17 : vector<16x1xf32>
    %19 = vector.broadcast %18 : vector<16x1xf32> to vector<16x32xf32>
    %20 = arith.mulf %15, %19 : vector<16x32xf32>
    %c0_5 = arith.constant 0 : index
    %c0_6 = arith.constant 0 : index
    %21 = vector.load %arg2[%c0_5, %c0_6] : memref<1x32xf32, #tpu.memory_space<vmem>>, vector<1x32xf32>
    %22 = vector.broadcast %21 : vector<1x32xf32> to vector<16x32xf32>
    %23 = arith.mulf %20, %22 : vector<16x32xf32>
    %c0_7 = arith.constant 0 : index
    %c0_8 = arith.constant 0 : index
    %24 = vector.load %arg3[%c0_7, %c0_8] : memref<1x32xf32, #tpu.memory_space<vmem>>, vector<1x32xf32>
    %25 = vector.broadcast %24 : vector<1x32xf32> to vector<16x32xf32>
    %26 = arith.addf %23, %25 : vector<16x32xf32>
    %27 = arith.truncf %26 : vector<16x32xf32> to vector<16x32xbf16>
    %c0_9 = arith.constant 0 : index
    %c0_10 = arith.constant 0 : index
    %28 = vector.load %arg4[%c0_9, %c0_10] : memref<16x32xbf16, #tpu.memory_space<vmem>>, vector<16x32xbf16>
    tpu.vector_store %arg4[%c0_9, %c0_10], %27 {strides = array<i32>} : memref<16x32xbf16, #tpu.memory_space<vmem>>, vector<16x32xbf16>,
    return
  }
  func.func @transform_0(%arg0: i32) -> (i32, i32) {
    %c0_i32 = arith.constant 0 : i32
    %c0_i32_0 = arith.constant 0 : i32
    return %arg0, %c0_i32 : i32, i32
  }
  func.func @transform_1(%arg0: i32) -> (i32, i32) {
    %c0_i32 = arith.constant 0 : i32
    %c0_i32_0 = arith.constant 0 : i32
    %c0_i32_1 = arith.constant 0 : i32
    return %c0_i32, %c0_i32_0 : i32, i32
  }
  func.func @transform_2(%arg0: i32) -> (i32, i32) {
    %c0_i32 = arith.constant 0 : i32
    %c0_i32_0 = arith.constant 0 : i32
    %c0_i32_1 = arith.constant 0 : i32
    return %c0_i32, %c0_i32_0 : i32, i32
  }
  func.func @transform_3(%arg0: i32) -> (i32, i32) {
    %c0_i32 = arith.constant 0 : i32
    %c0_i32_0 = arith.constant 0 : i32
    return %arg0, %c0_i32 : i32, i32
  }
}

</mosaic_0001>

<bundles_post_ra>
// kernel: tpu_custom_call.1
= control target key start
LH: loop header
LB: loop body
LE: loop exit
PB: predicated region body
PF: predicated region fallthrough
CT: control target
= control target key end

     0   :  { %8 = vsyncpa [#allocation3], 0  ;;  %s229_s0 = inlined_call_operand.hbm [shape: f32[16,32], index: 0, kind: input, shape index: {}]   ;;  %s230_s1 = inlined_call_operand.vmem [shape: f32[1,32], index: 1, kind: input, shape index: {}]   ;;  %s231_s2 = inlined_call_operand.vmem [shape: f32[1,32], index: 2, kind: input, shape index: {}]   ;;  %s232_s3 = inlined_call_operand.hbm [shape: bf16[16,32], index: 3, kind: output, shape index: {}]  }
   0x1   :  { %9 = vsyncpa [#allocation4], 0  ;;  %s169_s12 = smov [#allocation2]   ;;  %s121_s16 = scalar_lea.hbm %s229_s0, 256 }
   0x2   :  { %s15_s13 = sshll.u32 %s169_s12, 4  ;;  %p122_p0 = scmp.ne.s32.totalorder %s229_s0, %s121_s16  ;;  %s16_s13 = int_to_ptr.vmem [resolvable:$true] %s15_s13 }
   0x3   :  { %p125_p1 = scmp.lt.u32.totalorder %s121_s16, %s229_s0 }
   0x5   :  { %p127_p2 = pnand %p125_p1, %p122_p0 }
   0x7   :  { %130 = shalt.err (!%p127_p2)
}
   0x8   :  { %s131_s21 = scalar_lea.vmem %s16_s13, 256  ;;  %p136_p4 = scmp.lt.s32.totalorder %s16_s13, %s16_s13 }
   0x9   :  { %p132_p3 = scmp.ne.s32.totalorder %s16_s13, %s131_s21  ;;  %p137_p5 = scmp.lt.s32.totalorder %s131_s21, %s131_s21 }
   0xb   :  { %p138_p6 = por %p137_p5, %p136_p4 }
   0xd   :  { %p139_p7 = pnand %p138_p6, %p132_p3 }
   0xf   :  { %142 = shalt.err (!%p139_p7)
}
  0x10   :  { %s170_s22 = smov 128   ;;  %s171_s23 = smov 8  }
  0x11   :  { %21 = dma.hbm_to_vmem [thread:$0]  %s229_s0, 256, %s16_s13, [#allocation3], %s170_s22, %s170_s22, %s171_s23  }
  0x12   :  { %165 = dma.done.wait [#allocation3], 256  }
  0x13   :  { %166 = vsyncadd [#allocation3], 4294967040  ;;  %vm31_vm0 = vcmask 261120   ;;  %v29_v0 = vld [vmem:[#allocation2] sm:$0xff]  ;;  %v30_v1 = vld [vmem:[#allocation2 + $0x8] sm:$0xff]  ;;  %vm85_vm1 = vcmask 257024  }
  0x14   :  { %v32_v2 = vsel %vm31_vm0, %v29_v0, 0.0  ;;  %v35_v3 = vsel %vm31_vm0, %v30_v1, 0.0  ;;  %v105_v21 = vld [vmem:[%s230_s1] ss:$0 sm:$0xff]  ;;  %s172_s29 = smov [#allocation5]  }
  0x15   :  { %33 = vadd.xlane.f32.xlu0 %v32_v2  ;;  %v106_v23 = vld [vmem:[%s231_s2] ss:$0 sm:$0xff]  ;;  %s93_s30 = sshll.u32 %s172_s29, 4  ;;  %s94_s30 = int_to_ptr.vmem [resolvable:$true] %s93_s30 }
  0x16   :  { %s143_s1 = scalar_lea.vmem %s94_s30, 128  ;;  %p148_p9 = scmp.lt.s32.totalorder %s94_s30, %s94_s30 }
  0x17   :  { %p144_p8 = scmp.ne.s32.totalorder %s94_s30, %s143_s1  ;;  %p149_p10 = scmp.lt.s32.totalorder %s143_s1, %s143_s1 }
  0x19   :  { %36 = vadd.xlane.f32.xlu0 %v35_v3  ;;  %p150_p11 = por %p149_p10, %p148_p9 }
  0x1b   :  { %p151_p12 = pnand %p150_p11, %p144_p8 }
  0xa2   :  { %v34_v4 = vpop.xlane.xlu0 %33 }
  0xa3   :  { %v39_v5 = vmul.f32 0.03125, %v34_v4 }
  0xa5   :  { %v41_v6 = vsub.f32 %v29_v0, %v39_v5 }
  0xa6   :  { %v37_v7 = vpop.xlane.xlu0 %36 }
  0xa7   :  { %v40_v8 = vmul.f32 0.03125, %v37_v7  ;;  %v43_v9 = vmul.f32 %v41_v6, %v41_v6 }
  0xa9   :  { %v42_v10 = vsub.f32 %v30_v1, %v40_v8  ;;  %v45_v11 = vsel %vm31_vm0, %v43_v9, 0.0 }
  0xaa   :  { %46 = vadd.xlane.f32.xlu1 %v45_v11 }
  0xab   :  { %v44_v12 = vmul.f32 %v42_v10, %v42_v10 }
  0xad   :  { %v48_v13 = vsel %vm31_vm0, %v44_v12, 0.0 }
  0xae   :  { %49 = vadd.xlane.f32.xlu1 %v48_v13 }
 0x137   :  { %v47_v14 = vpop.xlane.xlu1 %46 }
 0x138   :  { %v51_v15 = vmul.f32 0.03125, %v47_v14 }
 0x13a   :  { %v53_v16 = vadd.f32 1e-12, %v51_v15 }
 0x13b   :  { %v50_v17 = vpop.xlane.xlu1 %49 }
 0x13c   :  { %117 = vrsqrt.f32 %v53_v16  ;;  %v52_v18 = vmul.f32 0.03125, %v50_v17 }
 0x13e   :  { %v54_v19 = vadd.f32 1e-12, %v52_v18 }
 0x140   :  { %119 = vrsqrt.f32 %v54_v19 }
 0x146   :  { %v118_v20 = vpop.eup %117 }
 0x147   :  { %v57_v22 = vmul.f32 %v118_v20, %v41_v6 }
 0x149   :  { %v66_v24 = vmul.f32 %v105_v21, %v57_v22 }
 0x14a   :  { %v120_v25 = vpop.eup %119 }
 0x14b   :  { %v58_v26 = vmul.f32 %v120_v25, %v42_v10  ;;  %v75_v27 = vadd.f32 %v106_v23, %v66_v24 }
 0x14d   :  { %v67_v28 = vmul.f32 %v105_v21, %v58_v26  ;;  %v109_v29 = vpack.c.bf16 %v75_v27, %v75_v27 }
 0x14f   :  { %v76_v30 = vadd.f32 %v106_v23, %v67_v28  ;;  %86 = vst.msk [vmem:[#allocation5] sm:$0xf] %vm85_vm1, %v109_v29 }
 0x151   :  { %v110_v31 = vpack.c.bf16 %v76_v30, %v76_v30 }
 0x153   :  { %87 = vst.msk [vmem:[#allocation5 + $0x4] sm:$0xf] %vm85_vm1, %v110_v31 }
 0x154   :  { %154 = shalt.err (!%p151_p12)
}
 0x155   :  { %s155_s5 = scalar_lea.hbm %s232_s3, 128 }
 0x156   :  { %p156_p13 = scmp.ne.s32.totalorder %s232_s3, %s155_s5  ;;  %p159_p0 = scmp.lt.u32.totalorder %s155_s5, %s232_s3 }
 0x158   :  { %p161_p1 = pnand %p159_p0, %p156_p13 }
 0x15a   :  { %164 = shalt.err (!%p161_p1)
}
 0x15b   :  { %s173_s10 = smov 64   ;;  %s174_s11 = smov 4  }
 0x15c   :  { %99 = dma.vmem_to_hbm [thread:$0]  %s94_s30, 128, %s232_s3, [#allocation4], %s173_s10, %s173_s10, %s174_s11  }
 0x15d   :  { %167 = dma.done.wait [#allocation4], 128  }
 0x15e   :  { %168 = vsyncadd [#allocation4], 4294967168 }
 0x15f   :  { %103 = vsyncpa [#allocation3], 1 }
 0x160   :  { %104 = vsyncpa [#allocation4], 1 }

</bundles_post_ra>
